<compile_context>
chip_gen: v7x
topology: tpu7x:2x2x1
jax: 0.10.0
libtpu: 0.0.40
codegen_flags: <defaults>
</compile_context>

<pallas_src>
import functools

import jax
import jax.numpy as jnp
from jax.experimental import pallas as pl
from jax.experimental.pallas import tpu as pltpu

H1 = 128      # first hidden width
H2 = 64       # self.hidden_feature in the PyTorch module
LANES = 128   # packed parameter-slab lane width
_NEG_BIG = -1.0e30   # finite "-inf" sentinel for the masked softmax


def _round_up(n, m):
    return ((n + m - 1) // m) * m


def _slab_rows(obs_features):
    """8-row-aligned row offsets of each parameter inside the packed slab."""
    row_w1 = 0
    row_b1 = _round_up(obs_features, 8)
    row_w2 = row_b1 + 8
    row_b2 = row_w2 + H1
    row_wh = row_b2 + 8
    row_bh = row_wh + H1
    total = row_bh + 8
    return row_w1, row_b1, row_w2, row_b2, row_wh, row_bh, total


def pack_params(params, obs_features, num_actions):
    """Pack all weights/biases into a single (R, 128) f32 slab.

    In a real RL loop this runs once per parameter update, not per step.
    """
    A = num_actions
    # Head layout must fit in the 128-lane slab (and the 8-lane output).
    assert 2 * A + 1 <= LANES, "num_actions too large for packed head layout"
    r_w1, r_b1, r_w2, r_b2, r_wh, r_bh, total = _slab_rows(obs_features)
    slab = jnp.zeros((total, LANES), jnp.float32)
    slab = slab.at[r_w1:r_w1 + obs_features, :].set(params["w1"])
    slab = slab.at[r_b1, :].set(params["b1"].reshape(H1))
    slab = slab.at[r_w2:r_w2 + H1, :H2].set(params["w2"])
    slab = slab.at[r_b2, :H2].set(params["b2"].reshape(H2))
    # Fused heads, laid out in the final output order:
    #   lanes [0:A)  = actor (logits)
    #   lanes [A:2A) = actor copy (softmax'd into probs in-kernel)
    #   lane  2A     = critic (state value)
    slab = slab.at[r_wh:r_wh + H2, 0:A].set(params["wa"])
    slab = slab.at[r_wh:r_wh + H2, A:2 * A].set(params["wa"])
    slab = slab.at[r_wh:r_wh + H2, 2 * A:2 * A + 1].set(params["wc"])
    slab = slab.at[r_bh, 0:A].set(params["ba"].reshape(A))
    slab = slab.at[r_bh, A:2 * A].set(params["ba"].reshape(A))
    slab = slab.at[r_bh, 2 * A:2 * A + 1].set(params["bc"].reshape(1))
    return slab


def ppo_net_kernel(x_ref, p_ref, out_ref, *, obs_features, num_actions,
                   out_lanes):
    A = num_actions
    r_w1, r_b1, r_w2, r_b2, r_wh, r_bh, _ = _slab_rows(obs_features)
    obs_pad = r_b1            # x is zero-padded to this K (multiple of 8)

    x = x_ref[...]                                            # (tB, obs_pad)

    # ---- encoding layer 1 (obs_pad -> 128) on the MXU.  Padded x columns
    #      and the corresponding w1 rows are zero, so they contribute nothing.
    h1 = jnp.dot(x, p_ref[r_w1:r_w1 + obs_pad, :],
                 preferred_element_type=jnp.float32)
    h1 = jnp.maximum(h1 + p_ref[r_b1:r_b1 + 1, :], 0.0)       # (tB, 128)

    # ---- encoding layer 2 (128 -> 64, zero-padded to 128 lanes) on the MXU.
    h2 = jnp.dot(h1, p_ref[r_w2:r_w2 + H1, :],
                 preferred_element_type=jnp.float32)
    h2 = jnp.maximum(h2 + p_ref[r_b2:r_b2 + 1, :], 0.0)       # cols 64: stay 0

    # ---- fused actor + critic heads: one matmul lands directly in the
    #      packed layout (logits | logits copy | value | zeros).
    y = jnp.dot(h2, p_ref[r_wh:r_wh + H1, :],
                preferred_element_type=jnp.float32)
    y = y + p_ref[r_bh:r_bh + 1, :]                           # (tB, 128)

    # ---- masked softmax over the logits copy -> probs, written in place.
    lane = jax.lax.broadcasted_iota(jnp.int32, y.shape, 1)
    prob_mask = (lane >= A) & (lane < 2 * A)
    masked = jnp.where(prob_mask, y, _NEG_BIG)                # finite sentinel
    m = jnp.max(masked, axis=-1, keepdims=True)
    e = jnp.exp(masked - m)                                   # ~0 outside mask
    s = jnp.sum(e, axis=-1, keepdims=True)
    r = pl.reciprocal(s, approx=True)                         # EUP rcp slot
    r = r * (2.0 - s * r)                                     # Newton: ~1e-7 rel
    packed = jnp.where(prob_mask, e * r, y)

    # Only the first out_lanes (= round_up(2A+1, 8)) lanes are useful; storing
    # the narrow slab cuts HBM writeback ~16x vs a 128-lane output.
    out_ref[...] = packed[:, :out_lanes]


def _choose_tile_b(B, tile_b):
    """Pick a batch tile: big (amortize grid-step overhead), >=2 grid steps
    when the batch allows (feeds both TCs on v7x), and dividing B when cheap
    (avoids wrapper-side pad/slice HBM passes)."""
    tb = min(max(tile_b, 8), _round_up(B, 8))
    if B >= 16:
        tb = min(tb, _round_up(-(-B // 2), 8))
    tb = max(8, (tb // 8) * 8)
    if B % tb:
        cand = tb
        lo = max(8, tb // 2)
        while cand >= lo:
            if B % cand == 0:
                return cand
            cand -= 8
    return tb


def cartpole_ppo_forward(x, param_slab, num_actions, *, tile_b=512,
                         return_packed=False):
    """x: (B, obs_features) f32; param_slab: output of pack_params.

    Returns (logits (B, A), probs (B, A), value (B, 1)), or — with
    return_packed=True — the raw (Bp, out_lanes) packed output so downstream
    consumers can avoid extra HBM slicing passes.
    """
    B, obs_features = x.shape
    A = num_actions
    obs_pad = _round_up(obs_features, 8)
    out_lanes = _round_up(2 * A + 1, 8)
    assert out_lanes <= LANES

    tb = _choose_tile_b(B, tile_b)
    Bp = _round_up(B, tb)
    nb = Bp // tb

    xp = x
    if Bp != B or obs_pad != obs_features:
        xp = jnp.pad(x, ((0, Bp - B), (0, obs_pad - obs_features)))

    kernel = functools.partial(ppo_net_kernel,
                               obs_features=obs_features,
                               num_actions=A,
                               out_lanes=out_lanes)

    cost = pl.CostEstimate(
        flops=2 * Bp * H1 * (obs_pad + H1 + H1),
        transcendentals=Bp * (A + 1),
        bytes_accessed=Bp * (obs_pad + out_lanes) * 4 + int(param_slab.size) * 4,
    )

    out = pl.pallas_call(
        kernel,
        grid=(nb,),
        in_specs=[
            pl.BlockSpec((tb, obs_pad), lambda i: (i, 0)),     # x tiles
            pl.BlockSpec(param_slab.shape, lambda i: (0, 0)),  # whole slab
        ],
        out_specs=pl.BlockSpec((tb, out_lanes), lambda i: (i, 0)),
        out_shape=jax.ShapeDtypeStruct((Bp, out_lanes), jnp.float32),
        compiler_params=pltpu.CompilerParams(
            dimension_semantics=("parallel",)),                # 2 TCs on v7x
        cost_estimate=cost,
    )(xp, param_slab)

    # NOTE: rows [B:Bp] are padding (their probs are 1/A); never consume them.
    if return_packed:
        return out
    out = out[:B]
    return out[:, :A], out[:, A:2 * A], out[:, 2 * A:2 * A + 1]


def init_params(key, obs_features, num_actions, hidden_feature=H2):
    ks = jax.random.split(key, 8)

    def lin(kw, kb, fan_in, fan_out):
        bound = 1.0 / jnp.sqrt(fan_in)
        w = jax.random.uniform(kw, (fan_in, fan_out), jnp.float32, -bound, bound)
        b = jax.random.uniform(kb, (1, fan_out), jnp.float32, -bound, bound)
        return w, b

    w1, b1 = lin(ks[0], ks[1], obs_features, H1)
    w2, b2 = lin(ks[2], ks[3], H1, hidden_feature)
    wa, ba = lin(ks[4], ks[5], hidden_feature, num_actions)
    wc, bc = lin(ks[6], ks[7], hidden_feature, 1)
    return dict(w1=w1, b1=b1, w2=w2, b2=b2, wa=wa, ba=ba, wc=wc, bc=bc)


def reference_forward(x, p):
    h1 = jnp.maximum(x @ p["w1"] + p["b1"], 0.0)
    h2 = jnp.maximum(h1 @ p["w2"] + p["b2"], 0.0)
    logits = h2 @ p["wa"] + p["ba"]
    probs = jax.nn.softmax(logits, axis=-1)
    value = h2 @ p["wc"] + p["bc"]
    return logits, probs, value


if __name__ == "__main__":
    key = jax.random.PRNGKey(0)
    k_x, k_p, k_x2 = jax.random.split(key, 3)

    OBS_FEATURES, NUM_ACTIONS = 4, 2   # CartPole-v1: obs=4, actions=2
    params = init_params(k_p, OBS_FEATURES, NUM_ACTIONS)
    slab = pack_params(params, OBS_FEATURES, NUM_ACTIONS)

    # Small batch (single grid step) — matches the spec's tiny-env usage.
    B = 8
    x = jax.random.normal(k_x, (B, OBS_FEATURES), dtype=jnp.float32)
    logits, probs, value = cartpole_ppo_forward(x, slab, NUM_ACTIONS)
    jax.block_until_ready((logits, probs, value))
    ref_logits, ref_probs, ref_value = reference_forward(x, params)
    assert jnp.allclose(logits, ref_logits, atol=1e-4, rtol=1e-4)
    assert jnp.allclose(probs, ref_probs, atol=1e-4, rtol=1e-4)
    assert jnp.allclose(value, ref_value, atol=1e-4, rtol=1e-4)

    # Larger rollout-style batch — exercises the multi-tile / padded-tail
    # path (>= 2 grid steps => both TensorCores get work on v7x).
    B2 = 1000
    x2 = jax.random.normal(k_x2, (B2, OBS_FEATURES), dtype=jnp.float32)
    logits2, probs2, value2 = cartpole_ppo_forward(x2, slab, NUM_ACTIONS)
    jax.block_until_ready((logits2, probs2, value2))
    r_logits2, r_probs2, r_value2 = reference_forward(x2, params)
    assert jnp.allclose(logits2, r_logits2, atol=1e-4, rtol=1e-4)
    assert jnp.allclose(probs2, r_probs2, atol=1e-4, rtol=1e-4)
    assert jnp.allclose(value2, r_value2, atol=1e-4, rtol=1e-4)

    print("KERNEL_OK")
</pallas_src>

<mosaic_0001>
module attributes {stable_mosaic.version = 11 : i64} {
  func.func @ppo_net_kernel(%arg0: i32, %arg1: memref<8x8xf32, #tpu.memory_space<vmem>>, %arg2: memref<288x128xf32, #tpu.memory_space<vmem>>, %arg3: memref<8x8xf32, #tpu.memory_space<vmem>>) attributes {dimension_semantics = [#tpu.dimension_semantics<parallel>], iteration_bounds = array<i64: 1>, scalar_prefetch = 0 : i64, scratch_operands = 0 : i64, tpu.core_type = #tpu.core_type<tc>, window_params = [{transform_indices = @transform_0, window_bounds = array<i64: 8, 8>}, {pipeline_mode = #tpu.pipeline_mode<synchronous>, transform_indices = @transform_1, window_bounds = array<i64: 288, 128>}, {transform_indices = @transform_2, window_bounds = array<i64: 8, 8>}]} {
    %c0 = arith.constant 0 : index
    %c0_0 = arith.constant 0 : index
    %0 = vector.load %arg1[%c0, %c0_0] : memref<8x8xf32, #tpu.memory_space<vmem>>, vector<8x8xf32>
    %c0_1 = arith.constant 0 : index
    %c0_2 = arith.constant 0 : index
    %1 = vector.load %arg2[%c0_1, %c0_2] : memref<288x128xf32, #tpu.memory_space<vmem>>, vector<8x128xf32>
    %cst = arith.constant dense<0.000000e+00> : vector<8x128xf32>
    %2 = tpu.matmul %0, %1, %cst {dimension_numbers = #tpu.dot_dimension_numbers<[1], [0], [0], [1], [0, 0, 1, 1], [], []>} : vector<8x8xf32>, vector<8x128xf32>, vector<8x128xf32> -> vector<8x128xf32>
    %c8 = arith.constant 8 : index
    %c0_3 = arith.constant 0 : index
    %3 = vector.load %arg2[%c8, %c0_3] : memref<288x128xf32, #tpu.memory_space<vmem>>, vector<1x128xf32>
    %4 = vector.broadcast %3 : vector<1x128xf32> to vector<8x128xf32>
    %5 = arith.addf %2, %4 : vector<8x128xf32>
    %cst_4 = arith.constant 0.000000e+00 : f32
    %6 = vector.broadcast %cst_4 : f32 to vector<8x128xf32>
    %7 = arith.maximumf %5, %6 : vector<8x128xf32>
    %c16 = arith.constant 16 : index
    %c0_5 = arith.constant 0 : index
    %8 = vector.load %arg2[%c16, %c0_5] : memref<288x128xf32, #tpu.memory_space<vmem>>, vector<128x128xf32>
    %cst_6 = arith.constant dense<0.000000e+00> : vector<8x128xf32>
    %9 = tpu.matmul %7, %8, %cst_6 {dimension_numbers = #tpu.dot_dimension_numbers<[1], [0], [0], [1], [0, 0, 1, 1], [], []>} : vector<8x128xf32>, vector<128x128xf32>, vector<8x128xf32> -> vector<8x128xf32>
    %c144 = arith.constant 144 : index
    %c0_7 = arith.constant 0 : index
    %10 = vector.load %arg2[%c144, %c0_7] : memref<288x128xf32, #tpu.memory_space<vmem>>, vector<1x128xf32>
    %11 = vector.broadcast %10 : vector<1x128xf32> to vector<8x128xf32>
    %12 = arith.addf %9, %11 : vector<8x128xf32>
    %cst_8 = arith.constant 0.000000e+00 : f32
    %13 = vector.broadcast %cst_8 : f32 to vector<8x128xf32>
    %14 = arith.maximumf %12, %13 : vector<8x128xf32>
    %c152 = arith.constant 152 : index
    %c0_9 = arith.constant 0 : index
    %15 = vector.load %arg2[%c152, %c0_9] : memref<288x128xf32, #tpu.memory_space<vmem>>, vector<128x128xf32>
    %cst_10 = arith.constant dense<0.000000e+00> : vector<8x128xf32>
    %16 = tpu.matmul %14, %15, %cst_10 {dimension_numbers = #tpu.dot_dimension_numbers<[1], [0], [0], [1], [0, 0, 1, 1], [], []>} : vector<8x128xf32>, vector<128x128xf32>, vector<8x128xf32> -> vector<8x128xf32>
    %c280 = arith.constant 280 : index
    %c0_11 = arith.constant 0 : index
    %17 = vector.load %arg2[%c280, %c0_11] : memref<288x128xf32, #tpu.memory_space<vmem>>, vector<1x128xf32>
    %18 = vector.broadcast %17 : vector<1x128xf32> to vector<8x128xf32>
    %19 = arith.addf %16, %18 : vector<8x128xf32>
    %20 = tpu.iota {dimensions = array<i32: 1>} : vector<8x128xi32>
    %c2_i32 = arith.constant 2 : i32
    %21 = vector.broadcast %c2_i32 : i32 to vector<8x128xi32>
    %22 = arith.cmpi sge, %20, %21 : vector<8x128xi32>
    %c4_i32 = arith.constant 4 : i32
    %23 = vector.broadcast %c4_i32 : i32 to vector<8x128xi32>
    %24 = arith.cmpi slt, %20, %23 : vector<8x128xi32>
    %25 = arith.andi %22, %24 : vector<8x128xi1>
    %cst_12 = arith.constant -1.000000e+30 : f32
    %26 = vector.broadcast %cst_12 : f32 to vector<8x128xf32>
    %27 = arith.select %25, %19, %26 : vector<8x128xi1>, vector<8x128xf32>
    %cst_13 = arith.constant dense<0xFF800000> : vector<8xf32>
    %28 = vector.multi_reduction <maximumf>, %27, %cst_13 [1] : vector<8x128xf32> to vector<8xf32>
    %29 = vector.shape_cast %28 : vector<8xf32> to vector<8x1xf32>
    %30 = vector.broadcast %29 : vector<8x1xf32> to vector<8x128xf32>
    %31 = arith.subf %27, %30 : vector<8x128xf32>
    %32 = math.exp %31 : vector<8x128xf32>
    %cst_14 = arith.constant dense<0.000000e+00> : vector<8xf32>
    %33 = vector.multi_reduction <add>, %32, %cst_14 [1] : vector<8x128xf32> to vector<8xf32>
    %34 = vector.shape_cast %33 : vector<8xf32> to vector<8x1xf32>
    %35 = tpu.reciprocal %34 {approx = true} : vector<8x1xf32> -> vector<8x1xf32>
    %36 = arith.mulf %34, %35 : vector<8x1xf32>
    %cst_15 = arith.constant 2.000000e+00 : f32
    %37 = vector.broadcast %cst_15 : f32 to vector<8x1xf32>
    %38 = arith.subf %37, %36 : vector<8x1xf32>
    %39 = arith.mulf %35, %38 : vector<8x1xf32>
    %40 = vector.broadcast %39 : vector<8x1xf32> to vector<8x128xf32>
    %41 = arith.mulf %32, %40 : vector<8x128xf32>
    %42 = arith.select %25, %41, %19 : vector<8x128xi1>, vector<8x128xf32>
    %43 = vector.extract_strided_slice %42 {offsets = [0, 0], sizes = [8, 8], strides = [1, 1]} : vector<8x128xf32> to vector<8x8xf32>
    %c0_16 = arith.constant 0 : index
    %c0_17 = arith.constant 0 : index
    %44 = vector.load %arg3[%c0_16, %c0_17] : memref<8x8xf32, #tpu.memory_space<vmem>>, vector<8x8xf32>
    tpu.vector_store %arg3[%c0_16, %c0_17], %43 {strides = array<i32>} : memref<8x8xf32, #tpu.memory_space<vmem>>, vector<8x8xf32>,
    return
  }
  func.func @transform_0(%arg0: i32) -> (i32, i32) {
    %c0_i32 = arith.constant 0 : i32
    %c0_i32_0 = arith.constant 0 : i32
    return %arg0, %c0_i32 : i32, i32
  }
  func.func @transform_1(%arg0: i32) -> (i32, i32) {
    %c0_i32 = arith.constant 0 : i32
    %c0_i32_0 = arith.constant 0 : i32
    %c0_i32_1 = arith.constant 0 : i32
    return %c0_i32, %c0_i32_0 : i32, i32
  }
  func.func @transform_2(%arg0: i32) -> (i32, i32) {
    %c0_i32 = arith.constant 0 : i32
    %c0_i32_0 = arith.constant 0 : i32
    return %arg0, %c0_i32 : i32, i32
  }
}

</mosaic_0001>

<bundles_post_ra>
// kernel: tpu_custom_call.1
= control target key start
LH: loop header
LB: loop body
LE: loop exit
PB: predicated region body
PF: predicated region fallthrough
CT: control target
= control target key end

     0   :  { %7 = vsyncpa [#allocation3], 0  ;;  %s681_s0 = inlined_call_operand.hbm [shape: f32[8,8], index: 0, kind: input, shape index: {}]   ;;  %s682_s1 = inlined_call_operand.hbm [shape: f32[288,128], index: 1, kind: input, shape index: {}]   ;;  %s683_s2 = inlined_call_operand.hbm [shape: f32[8,8], index: 2, kind: output, shape index: {}]  }
   0x1   :  { %8 = vsyncpa [#allocation6], 0 }
   0x2   :  { %9 = vsyncpa [#allocation4], 0  ;;  %s586_s9 = smov [#allocation2]   ;;  %s587_s11 = smov [#allocation5]  }
   0x3   :  { %s16_s10 = sshll.u32 %s586_s9, 4  ;;  %s25_s12 = sshll.u32 %s587_s11, 4  ;;  %s17_s10 = int_to_ptr.vmem [resolvable:$true] %s16_s10  ;;  %s609_s12 = int_to_ptr.vmem [resolvable:$true] %s25_s12 }
   0x4   :  { %s514_s15 = scalar_lea.hbm %s681_s0, 128 }
   0x5   :  { %p515_p0 = scmp.ne.s32.totalorder %s681_s0, %s514_s15  ;;  %p518_p1 = scmp.lt.u32.totalorder %s514_s15, %s681_s0 }
   0x7   :  { %p520_p2 = pnand %p518_p1, %p515_p0 }
   0x9   :  { %523 = shalt.err (!%p520_p2)
}
   0xa   :  { %s524_s20 = scalar_lea.vmem %s17_s10, 128  ;;  %p529_p4 = scmp.lt.s32.totalorder %s17_s10, %s17_s10 }
   0xb   :  { %p525_p3 = scmp.ne.s32.totalorder %s17_s10, %s524_s20  ;;  %p530_p5 = scmp.lt.s32.totalorder %s524_s20, %s524_s20 }
   0xd   :  { %p531_p6 = por %p530_p5, %p529_p4 }
   0xf   :  { %p532_p7 = pnand %p531_p6, %p525_p3 }
  0x11   :  { %535 = shalt.err (!%p532_p7)
}
  0x12   :  { %19 = dma.hbm_to_vmem [thread:$0]  %s681_s0, 128, %s17_s10, [#allocation3]  }
  0x13   :  { %s536_s25 = scalar_lea.hbm %s682_s1, 4608 }
  0x14   :  { %p537_p8 = scmp.ne.s32.totalorder %s682_s1, %s536_s25  ;;  %p540_p9 = scmp.lt.u32.totalorder %s536_s25, %s682_s1 }
  0x16   :  { %p542_p10 = pnand %p540_p9, %p537_p8 }
  0x18   :  { %545 = shalt.err (!%p542_p10)
}
  0x19   :  { %s546_s30 = scalar_lea.vmem %s609_s12, 4608  ;;  %p551_p12 = scmp.lt.s32.totalorder %s609_s12, %s609_s12 }
  0x1a   :  { %p547_p11 = scmp.ne.s32.totalorder %s609_s12, %s546_s30  ;;  %p552_p13 = scmp.lt.s32.totalorder %s546_s30, %s546_s30 }
  0x1c   :  { %p553_p0 = por %p552_p13, %p551_p12 }
  0x1e   :  { %p554_p1 = pnand %p553_p0, %p547_p11 }
  0x20   :  { %557 = shalt.err (!%p554_p1)
}
  0x21   :  { %s588_s0 = smov 128   ;;  %s589_s3 = smov 8  }
  0x22   :  { %31 = dma.hbm_to_vmem [thread:$0]  %s682_s1, 4608, %s609_s12, [#allocation6], %s588_s0, %s588_s0, %s589_s3  }
  0x23   :  { %580 = dma.done.wait [#allocation3], 128  }
  0x24   :  { %581 = vsyncadd [#allocation3], 4294967168 }
  0x25   :  { %582 = dma.done.wait [#allocation6], 4608  }
  0x26   :  { %583 = vsyncadd [#allocation6], 4294962688  ;;  %v590_v0 = vmov 0.0   ;;  %vm591_vm0 = vmmov 0   ;;  %v592_v1 = vmov 0.0|0.0   ;;  %vm45_vm1 = vcmask 64512  }
  0x27   :  { %379 = vmatprep.subr.mxu0 %v590_v0  ;;  %381 = vmatprep.mubr.msk.f32.mxu0 %vm591_vm0, %v590_v0  ;;  %v39_v2 = vld [vmem:[#allocation5] sm:$0xff]  ;;  %v38_v3 = vld [vmem:[#allocation2] sm:$0xff]  ;;  %v120_v4 = vld [vmem:[#allocation5 + $0x10] sm:$0xff]  ;;  %v303_v62 = vlaneseq  ;;  %s593_s1 = smov [#allocation7]  }
  0x28   :  { %454 = vmatprep.subr.bf16.mxu1 %v592_v1  ;;  %416 = vmatprep.mubr.msk.f32.mxu1 %vm591_vm0, %v590_v0  ;;  %v121_v5 = vld [vmem:[#allocation5 + $0x18] sm:$0xff]  ;;  %v122_v6 = vld [vmem:[#allocation5 + $0x20] sm:$0xff]  ;;  %v123_v7 = vld [vmem:[#allocation5 + $0x28] sm:$0xff]  ;;  %s329_s6 = sshll.u32 %s593_s1, 4  ;;  %s330_s6 = int_to_ptr.vmem [resolvable:$true] %s329_s6 }
  0x29   :  { %380 = vmatpush3.msra.mxu0 %v39_v2  ;;  %v455_v8 = vpack.c.bf16 %v121_v5, %v120_v4  ;;  %v458_v9 = vpack.c.bf16 %v123_v7, %v122_v6  ;;  %v124_v10 = vld [vmem:[#allocation5 + $0x30] sm:$0xff]  ;;  %v125_v11 = vld [vmem:[#allocation5 + $0x38] sm:$0xff]  ;;  %v126_v13 = vld [vmem:[#allocation5 + $0x40] sm:$0xff]  ;;  %v304_v63 = vand.u32 127, %v303_v62  ;;  %s558_s7 = scalar_lea.vmem %s330_s6, 128  ;;  %p563_p3 = scmp.lt.s32.totalorder %s330_s6, %s330_s6 }
  0x2a   :  { %382 = vmatmul.mubr.msk.f32.vlgmr.msra.gmra.mrb[0].mxu0 %vm45_vm1, %v38_v3  ;;  %478 = vmatprep.subr.bf16.mxu0 %v592_v1  ;;  %v461_v12 = vpack.c.bf16 %v125_v11, %v124_v10  ;;  %v127_v14 = vld [vmem:[#allocation5 + $0x48] sm:$0xff]  ;;  %v128_v16 = vld [vmem:[#allocation5 + $0x50] sm:$0xff]  ;;  %v129_v17 = vld [vmem:[#allocation5 + $0x58] sm:$0xff]  ;;  %p559_p2 = scmp.ne.s32.totalorder %s330_s6, %s558_s7  ;;  %p564_p4 = scmp.lt.s32.totalorder %s558_s7, %s558_s7 }
  0x2b   :  { %451 = vmatprep.mubr.msk.f32.mxu0 %vm591_vm0, %v590_v0  ;;  %456 = vmatpush3.bf16.msra.mxu1 %v455_v8  ;;  %v464_v15 = vpack.c.bf16 %v127_v14, %v126_v13  ;;  %v467_v18 = vpack.c.bf16 %v129_v17, %v128_v16  ;;  %v130_v19 = vld [vmem:[#allocation5 + $0x60] sm:$0xff]  ;;  %v131_v20 = vld [vmem:[#allocation5 + $0x68] sm:$0xff]  ;;  %v132_v22 = vld [vmem:[#allocation5 + $0x70] sm:$0xff]  ;;  %vm305_vm2 = vcmp.ge.s32.totalorder %v304_v63, 2  ;;  %vm306_vm3 = vcmp.lt.s32.totalorder %v304_v63, 4 }
  0x2c   :  { %457 = vmatprep.subr.bf16.mxu1 %v592_v1  ;;  %v470_v21 = vpack.c.bf16 %v131_v20, %v130_v19  ;;  %v133_v23 = vld [vmem:[#allocation5 + $0x78] sm:$0xff]  ;;  %v134_v25 = vld [vmem:[#allocation5 + $0x80] sm:$0xff]  ;;  %v135_v26 = vld [vmem:[#allocation5 + $0x88] sm:$0xff]  ;;  %p565_p5 = por %p564_p4, %p563_p3 }
  0x2d   :  { %v473_v24 = vpack.c.bf16 %v133_v23, %v132_v22  ;;  %v476_v27 = vpack.c.bf16 %v135_v26, %v134_v25  ;;  %v212_v28 = vld [vmem:[#allocation5 + $0x98] sm:$0xff]  ;;  %v213_v29 = vld [vmem:[#allocation5 + $0xa0] sm:$0xff]  ;;  %v214_v30 = vld [vmem:[#allocation5 + $0xa8] sm:$0xff] }
  0x2e   :  { %v479_v31 = vpack.c.bf16 %v213_v29, %v212_v28  ;;  %v215_v32 = vld [vmem:[#allocation5 + $0xb0] sm:$0xff]  ;;  %v216_v34 = vld [vmem:[#allocation5 + $0xb8] sm:$0xff]  ;;  %v217_v35 = vld [vmem:[#allocation5 + $0xc0] sm:$0xff]  ;;  %p566_p6 = pnand %p565_p5, %p559_p2 }
  0x2f   :  { %459 = vmatpush3.bf16.msra.mxu1 %v458_v9  ;;  %v482_v33 = vpack.c.bf16 %v215_v32, %v214_v30  ;;  %v485_v36 = vpack.c.bf16 %v217_v35, %v216_v34  ;;  %v218_v37 = vld [vmem:[#allocation5 + $0xc8] sm:$0xff]  ;;  %v219_v38 = vld [vmem:[#allocation5 + $0xd0] sm:$0xff]  ;;  %v220_v40 = vld [vmem:[#allocation5 + $0xd8] sm:$0xff] }
  0x30   :  { %460 = vmatprep.subr.bf16.mxu1 %v592_v1  ;;  %480 = vmatpush3.bf16.msra.mxu0 %v479_v31  ;;  %v488_v39 = vpack.c.bf16 %v219_v38, %v218_v37  ;;  %v221_v41 = vld [vmem:[#allocation5 + $0xe0] sm:$0xff]  ;;  %v222_v43 = vld [vmem:[#allocation5 + $0xe8] sm:$0xff]  ;;  %v223_v44 = vld [vmem:[#allocation5 + $0xf0] sm:$0xff] }
  0x31   :  { %481 = vmatprep.subr.bf16.mxu0 %v592_v1  ;;  %v491_v42 = vpack.c.bf16 %v221_v41, %v220_v40  ;;  %v494_v45 = vpack.c.bf16 %v223_v44, %v222_v43  ;;  %v224_v46 = vld [vmem:[#allocation5 + $0xf8] sm:$0xff]  ;;  %v225_v47 = vld [vmem:[#allocation5 + $0x100] sm:$0xff]  ;;  %v339_v49 = vld [vmem:[#allocation5 + $0x8] ss:$0 sm:$0xff] }
  0x32   :  { %v497_v48 = vpack.c.bf16 %v225_v47, %v224_v46  ;;  %v226_v54 = vld [vmem:[#allocation5 + $0x108] sm:$0xff]  ;;  %v227_v55 = vld [vmem:[#allocation5 + $0x110] sm:$0xff]  ;;  %v342_v0 = vld [vmem:[#allocation5 + $0x118] ss:$0 sm:$0xff] }
  0x33   :  { %462 = vmatpush3.bf16.msra.mxu1 %v461_v12  ;;  %v500_v56 = vpack.c.bf16 %v227_v55, %v226_v54  ;;  %v341_v57 = vld [vmem:[#allocation5 + $0x90] ss:$0 sm:$0xff]  ;;  %vm660_vm4 = vmand %vm305_vm2, %vm306_vm3 }
  0x34   :  { %463 = vmatprep.subr.bf16.mxu1 %v592_v1  ;;  %483 = vmatpush3.bf16.msra.mxu0 %v482_v33 }
  0x35   :  { %484 = vmatprep.subr.bf16.mxu0 %v592_v1 }
  0x37   :  { %465 = vmatpush3.bf16.msra.mxu1 %v464_v15 }
  0x38   :  { %466 = vmatprep.subr.bf16.mxu1 %v592_v1  ;;  %486 = vmatpush3.bf16.msra.mxu0 %v485_v36 }
  0x39   :  { %487 = vmatprep.subr.bf16.mxu0 %v592_v1 }
  0x3b   :  { %468 = vmatpush3.bf16.msra.mxu1 %v467_v18 }
  0x3c   :  { %469 = vmatprep.subr.bf16.mxu1 %v592_v1  ;;  %489 = vmatpush3.bf16.msra.mxu0 %v488_v39 }
  0x3d   :  { %490 = vmatprep.subr.bf16.mxu0 %v592_v1 }
  0x3f   :  { %471 = vmatpush3.bf16.msra.mxu1 %v470_v21 }
  0x40   :  { %472 = vmatprep.subr.bf16.mxu1 %v592_v1  ;;  %492 = vmatpush3.bf16.msra.mxu0 %v491_v42 }
  0x41   :  { %493 = vmatprep.subr.bf16.mxu0 %v592_v1 }
  0x43   :  { %474 = vmatpush3.bf16.msra.mxu1 %v473_v24 }
  0x44   :  { %475 = vmatprep.subr.bf16.mxu1 %v592_v1  ;;  %495 = vmatpush3.bf16.msra.mxu0 %v494_v45 }
  0x45   :  { %496 = vmatprep.subr.bf16.mxu0 %v592_v1 }
  0x47   :  { %477 = vmatpush3.bf16.msra.mxu1 %v476_v27 }
  0x48   :  { %498 = vmatpush3.bf16.msra.mxu0 %v497_v48 }
  0x49   :  { %499 = vmatprep.subr.bf16.mxu0 %v592_v1 }
  0x4c   :  { %501 = vmatpush3.bf16.msra.mxu0 %v500_v56 }
  0xfd   :  { %v115_v50 = vpop.f32.mrb[0].mxu0 }
  0xfe   :  { %v116_v51 = vadd.f32 %v339_v49, %v115_v50  ;;  %v383_v52 = vpop.f32.mrb[1].mxu0 }
 0x100   :  { %v119_v53 = vmax.f32 %v116_v51, 0.0 }
 0x102   :  { %417 = vmatmul.mubr.f32.vlgmr.msra.gmra.mrb[0].mxu1 %v119_v53 }
 0x1d5   :  { %v207_v58 = vpop.f32.mrb[0].mxu1 }
 0x1d6   :  { %v208_v59 = vadd.f32 %v341_v57, %v207_v58  ;;  %v418_v60 = vpop.f32.mrb[1].mxu1 }
 0x1d8   :  { %v211_v61 = vmax.f32 %v208_v59, 0.0 }
 0x1da   :  { %452 = vmatmul.mubr.f32.vlgmr.msra.gmra.mrb[2].mxu0 %v211_v61 }
 0x2ad   :  { %v299_v1 = vpop.f32.mrb[2].mxu0 }
 0x2ae   :  { %v300_v3 = vadd.f32 %v342_v0, %v299_v1  ;;  %v453_v4 = vpop.f32.mrb[3].mxu0 }
 0x2b0   :  { %v308_v5 = vsel %vm660_vm4, %v300_v3, -1e+30 }
 0x2b1   :  { %309 = vmax.xlane.f32.xlu0 %v308_v5 }
 0x33e   :  { %v310_v6 = vpop.xlane.xlu0 %309 }
 0x33f   :  { %v311_v7 = vsub.f32 %v308_v5, %v310_v6 }
 0x341   :  { %v312_v8 = vmul.f32 1.442695, %v311_v7 }
 0x343   :  { %510 = vpow2.f32 %v312_v8 }
 0x34d   :  { %v511_v9 = vpop.eup %510 }
 0x34e   :  { %314 = vadd.xlane.f32.xlu0 %v511_v9 }
 0x3db   :  { %v315_v10 = vpop.xlane.xlu0 %314 }
 0x3dc   :  { %512 = vrcp.f32 %v315_v10 }
 0x3e6   :  { %v513_v11 = vpop.eup %512 }
 0x3e7   :  { %v317_v12 = vmul.f32 %v513_v11, %v315_v10 }
 0x3e9   :  { %v318_v13 = vsub.f32 2.0, %v317_v12 }
 0x3eb   :  { %v319_v14 = vmul.f32 %v513_v11, %v318_v13 }
 0x3ed   :  { %v320_v15 = vmul.f32 %v511_v9, %v319_v14 }
 0x3ef   :  { %v321_v16 = vsel %vm660_vm4, %v320_v15, %v300_v3 }
 0x3f0   :  { %322 = vst.msk [vmem:[#allocation7] sm:$0xff] %vm45_vm1, %v321_v16 }
 0x3f1   :  { %569 = shalt.err (!%p566_p6)
}
 0x3f2   :  { %s570_s10 = scalar_lea.hbm %s683_s2, 128 }
 0x3f3   :  { %p571_p7 = scmp.ne.s32.totalorder %s683_s2, %s570_s10  ;;  %p574_p8 = scmp.lt.u32.totalorder %s570_s10, %s683_s2 }
 0x3f5   :  { %p576_p9 = pnand %p574_p8, %p571_p7 }
 0x3f7   :  { %579 = shalt.err (!%p576_p9)
}
 0x3f8   :  { %332 = dma.vmem_to_hbm [thread:$0]  %s330_s6, 128, %s683_s2, [#allocation4]  }
 0x3f9   :  { %584 = dma.done.wait [#allocation4], 128  }
 0x3fa   :  { %585 = vsyncadd [#allocation4], 4294967168 }
 0x3fb   :  { %336 = vsyncpa [#allocation3], 1 }
 0x3fc   :  { %337 = vsyncpa [#allocation6], 1 }
 0x3fd   :  { %338 = vsyncpa [#allocation4], 1 }

</bundles_post_ra>
